<compile_context>
chip_gen: v5e
topology: v5e:2x2
jax: 0.10.0
libtpu: 0.0.40
codegen_flags: <defaults>
</compile_context>

<pallas_src>
import functools

import jax
import jax.numpy as jnp
from jax.experimental import pallas as pl
from jax.experimental.pallas import tpu as pltpu


# Slabs at or below this size run as a single block (block dims == array dims).
_SINGLE_BLOCK_BYTES = 512 * 1024


def _round_up(x, m):
    return ((x + m - 1) // m) * m


def _select_lanes(n):
    """Largest lane width in {1024, 512, 256, 128} that divides n (else 128)."""
    for lanes in (1024, 512, 256, 128):
        if n % lanes == 0:
            return lanes
    return 128


@functools.lru_cache(maxsize=1)
def _chip_budget():
    """(target_block_bytes, vmem_limit_bytes) per TPU generation."""
    vmem = 64 * 1024 * 1024  # conservative default (v7x-sized)
    try:
        vmem = int(pltpu.get_tpu_info().vmem_capacity_bytes)
    except Exception:
        pass
    if vmem >= 96 * 1024 * 1024:
        # v5e / v6e: 128 MiB VMEM -> 8 MiB blocks, 2-in + 2-out buffered = 32 MiB.
        return 8 * 1024 * 1024, 64 * 1024 * 1024
    # v7x (64 MiB VMEM) or unknown: 4 MiB blocks, 16 MiB in flight.
    return 4 * 1024 * 1024, 32 * 1024 * 1024


def _isrlu_kernel(x_ref, o_ref, *, alpha):
    xf = x_ref[...].astype(jnp.float32)
    # Branch-free: for x >= 0, min(x, 0) = 0 -> rsqrt(1) = 1 -> output is x.
    # rsqrt lowers to the EUP (separate bundle slot -> essentially free).
    xn = jnp.minimum(xf, 0.0)
    o_ref[...] = (xf * jax.lax.rsqrt(1.0 + alpha * xn * xn)).astype(o_ref.dtype)


def isrlu(x, alpha=1.0, *, single_block_bytes=_SINGLE_BLOCK_BYTES):
    """ISRLU applied elementwise; output has the same shape/dtype as x."""
    if alpha < 0:
        raise ValueError("ISRLU is only defined for alpha >= 0.")

    orig_shape = x.shape
    orig_dtype = x.dtype
    n = x.size
    if n == 0:
        return x

    itemsize = x.dtype.itemsize
    # Minimum sublane multiple per dtype width (f32: 8, bf16: 16, int8/fp8: 32).
    sublane = {4: 8, 2: 16, 1: 32}.get(itemsize, 8)

    # Lane-dense slab layout: (rows, lanes) with lanes a multiple of 128.
    lanes = _select_lanes(n)
    rows = pl.cdiv(n, lanes)
    padded = rows * lanes
    needs_pad = padded != n  # only a lane remainder ever forces a pad/slice

    target_block_bytes, vmem_limit = _chip_budget()
    total_bytes = padded * itemsize
    if total_bytes <= single_block_bytes:
        # Single block covering the slab; block dims == array dims, so no
        # (8,128) divisibility requirement applies.
        block_rows = rows
    else:
        # Multi-step grid: at least 2 steps (v7x megacore + pipelining), at
        # most target_block_bytes per step, rows a multiple of the sublane.
        cap = max(sublane,
                  (target_block_bytes // (lanes * itemsize)) // sublane * sublane)
        block_rows = max(sublane, min(cap, _round_up(pl.cdiv(rows, 2), sublane)))
    grid = (pl.cdiv(rows, block_rows),)

    x_flat = jnp.ravel(x)
    if needs_pad:
        x_flat = jnp.pad(x_flat, (0, padded - n))  # isrlu(0) = 0, padding safe
    x2d = x_flat.reshape(rows, lanes)

    # TODO(synk): when the caller can donate x and dtype is unchanged, add
    # input_output_aliases={0: 0} to halve peak HBM footprint.
    out2d = pl.pallas_call(
        functools.partial(_isrlu_kernel, alpha=float(alpha)),
        out_shape=jax.ShapeDtypeStruct((rows, lanes), orig_dtype),
        grid_spec=pltpu.PrefetchScalarGridSpec(
            num_scalar_prefetch=0,
            grid=grid,
            in_specs=[pl.BlockSpec((block_rows, lanes), lambda i: (i, 0))],
            out_specs=pl.BlockSpec((block_rows, lanes), lambda i: (i, 0)),
        ),
        compiler_params=pltpu.CompilerParams(
            dimension_semantics=("parallel",),
            vmem_limit_bytes=vmem_limit,
        ),
    )(x2d)

    if needs_pad:
        return out2d.reshape(-1)[:n].reshape(orig_shape)
    return out2d.reshape(orig_shape)


def _isrlu_ref(x, alpha=1.0):
    xf = x.astype(jnp.float32)
    return jnp.where(xf >= 0.0, xf, xf / jnp.sqrt(1.0 + alpha * xf * xf)).astype(
        x.dtype
    )


if __name__ == "__main__":
    key = jax.random.PRNGKey(0)
    k0, k1, k2 = jax.random.split(key, 3)

    # 1) Small NCHW input per the module's (N, *) contract: 2*4*16*16 = 2048
    #    elements = 2 x 1024 lanes -> zero-copy single-block fast path.
    x = jax.random.normal(k0, (2, 4, 16, 16), dtype=jnp.float32)
    out = jax.block_until_ready(isrlu(x, 1.0))
    ref = _isrlu_ref(x, 1.0)
    assert out.shape == x.shape and out.dtype == x.dtype
    assert jnp.allclose(out, ref, atol=1e-6, rtol=1e-6)

    # 2) Ragged size (1344 elems): lane-remainder padding only; tiny
    #    single_block_bytes forces a multi-step parallel grid whose final
    #    row-block is ragged (write-masked by Pallas).
    x2 = jax.random.normal(k1, (3, 7, 64), dtype=jnp.float32)
    out2 = jax.block_until_ready(isrlu(x2, 0.5, single_block_bytes=1024))
    ref2 = _isrlu_ref(x2, 0.5)
    assert out2.shape == x2.shape and out2.dtype == x2.dtype
    assert jnp.allclose(out2, ref2, atol=1e-6, rtol=1e-6)

    # 3) Multiple of 1024 lanes but not of the block size: previously padded
    #    and sliced, now zero-copy multi-block with a ragged final block.
    x3 = jax.random.normal(k2, (300, 1024), dtype=jnp.float32)
    out3 = jax.block_until_ready(isrlu(x3, 2.0))
    ref3 = _isrlu_ref(x3, 2.0)
    assert out3.shape == x3.shape and out3.dtype == x3.dtype
    assert jnp.allclose(out3, ref3, atol=1e-6, rtol=1e-6)

    print("KERNEL_OK")
</pallas_src>

<mosaic_0001>
module attributes {stable_mosaic.version = 11 : i64} {
  func.func @_isrlu_kernel(%arg0: i32, %arg1: memref<2x1024xf32, #tpu.memory_space<vmem>>, %arg2: memref<2x1024xf32, #tpu.memory_space<vmem>>) attributes {dimension_semantics = [#tpu.dimension_semantics<parallel>], iteration_bounds = array<i64: 1>, scalar_prefetch = 0 : i64, scratch_operands = 0 : i64, tpu.core_type = #tpu.core_type<tc>, window_params = [{transform_indices = @transform_0, window_bounds = array<i64: 2, 1024>}, {transform_indices = @transform_1, window_bounds = array<i64: 2, 1024>}]} {
    %c0 = arith.constant 0 : index
    %c0_0 = arith.constant 0 : index
    %0 = vector.load %arg1[%c0, %c0_0] : memref<2x1024xf32, #tpu.memory_space<vmem>>, vector<2x1024xf32>
    %cst = arith.constant 0.000000e+00 : f32
    %1 = vector.broadcast %cst : f32 to vector<2x1024xf32>
    %2 = arith.minimumf %0, %1 : vector<2x1024xf32>
    %cst_1 = arith.constant 1.000000e+00 : f32
    %3 = vector.broadcast %cst_1 : f32 to vector<2x1024xf32>
    %4 = arith.mulf %3, %2 : vector<2x1024xf32>
    %5 = arith.mulf %4, %2 : vector<2x1024xf32>
    %cst_2 = arith.constant 1.000000e+00 : f32
    %6 = vector.broadcast %cst_2 : f32 to vector<2x1024xf32>
    %7 = arith.addf %6, %5 : vector<2x1024xf32>
    %8 = math.rsqrt %7 : vector<2x1024xf32>
    %9 = arith.mulf %0, %8 : vector<2x1024xf32>
    %c0_3 = arith.constant 0 : index
    %c0_4 = arith.constant 0 : index
    %10 = vector.load %arg2[%c0_3, %c0_4] : memref<2x1024xf32, #tpu.memory_space<vmem>>, vector<2x1024xf32>
    tpu.vector_store %arg2[%c0_3, %c0_4], %9 {strides = array<i32>} : memref<2x1024xf32, #tpu.memory_space<vmem>>, vector<2x1024xf32>,
    return
  }
  func.func @transform_0(%arg0: i32) -> (i32, i32) {
    %c0_i32 = arith.constant 0 : i32
    %c0_i32_0 = arith.constant 0 : i32
    return %arg0, %c0_i32 : i32, i32
  }
  func.func @transform_1(%arg0: i32) -> (i32, i32) {
    %c0_i32 = arith.constant 0 : i32
    %c0_i32_0 = arith.constant 0 : i32
    return %arg0, %c0_i32 : i32, i32
  }
}

</mosaic_0001>

<bundles_post_ra>
// kernel: tpu_custom_call.1
= control target key start
LH: loop header
LB: loop body
LE: loop exit
PB: predicated region body
PF: predicated region fallthrough
CT: control target
= control target key end

     0   :  { %6 = vsyncpa [#allocation3], 0  ;;  %s148_s0 = inlined_call_operand.hbm [shape: f32[2,1024], index: 0, kind: input, shape index: {}]   ;;  %s149_s1 = inlined_call_operand.hbm [shape: f32[2,1024], index: 1, kind: output, shape index: {}]  }
   0x1   :  { %7 = vsyncpa [#allocation4], 0  ;;  %s13_s8 = sshll.u32 %s148_s0, 4  ;;  %s130_s9 = smov [#allocation2]   ;;  %s14_s8 = int_to_ptr.hbm [resolvable:$true] %s13_s8 }
   0x2   :  { %s15_s10 = sshll.u32 %s130_s9, 4  ;;  %s16_s10 = int_to_ptr.vmem [resolvable:$true] %s15_s10 }
   0x3   :  { %18 = dma.hbm_to_vmem [thread:$0]  %s14_s8, 256, %s16_s10, [#allocation3]  }
   0x4   :  { %126 = dma.done.wait [#allocation3], 256  }
   0x5   :  { %127 = vsyncadd [#allocation3], 4294967040  ;;  %v23_v0 = vld [vmem:[#allocation2] sm:$0xff]  ;;  %v24_v1 = vld [vmem:[#allocation2 + $0x8] sm:$0xff]  ;;  %s131_s0 = smov [#allocation5]   ;;  %s62_s14 = sshll.u32 %s149_s1, 4  ;;  %s63_s14 = int_to_ptr.hbm [resolvable:$true] %s62_s14 }
   0x6   :  { %v25_v2 = vmin.f32 %v23_v0, 0.0  ;;  %v26_v3 = vmin.f32 %v24_v1, 0.0  ;;  %s60_s11 = sshll.u32 %s131_s0, 4  ;;  %s61_s11 = int_to_ptr.vmem [resolvable:$true] %s60_s11 }
   0x8   :  { %v27_v4 = vmul.f32 %v25_v2, %v25_v2  ;;  %v28_v5 = vmul.f32 %v26_v3, %v26_v3 }
   0xa   :  { %v29_v6 = vadd.f32 1.0, %v27_v4  ;;  %v30_v7 = vadd.f32 1.0, %v28_v5 }
   0xc   :  { %74 = vrsqrt.f32 %v29_v6  ;;  %vm37_vm0 = vweird.f32 %v29_v6  ;;  %vm47_vm2 = vweird.f32 %v30_v7 }
   0xd   :  { %76 = vrsqrt.f32 %v30_v7 }
  0x12   :  { %v75_v8 = vpop.eup %74 }
  0x13   :  { %v77_v9 = vpop.eup %76  ;;  %v32_v10 = vmul.f32 %v75_v8, %v29_v6  ;;  %vm38_vm1 = vweird.f32 %v75_v8 }
  0x14   :  { %v42_v11 = vmul.f32 %v77_v9, %v30_v7  ;;  %vm48_vm3 = vweird.f32 %v77_v9  ;;  %vm39_vm4 = vmor %vm37_vm0, %vm38_vm1 }
  0x15   :  { %v33_v12 = vmul.f32 %v75_v8, %v32_v10  ;;  %vm49_vm5 = vmor %vm47_vm2, %vm48_vm3 }
  0x16   :  { %v43_v13 = vmul.f32 %v77_v9, %v42_v11 }
  0x17   :  { %v34_v14 = vmul.f32 0.5, %v33_v12 }
  0x18   :  { %v44_v15 = vmul.f32 0.5, %v43_v13 }
  0x19   :  { %v35_v16 = vsub.f32 1.5, %v34_v14 }
  0x1a   :  { %v45_v17 = vsub.f32 1.5, %v44_v15 }
  0x1b   :  { %v36_v18 = vmul.f32 %v75_v8, %v35_v16 }
  0x1c   :  { %v46_v19 = vmul.f32 %v77_v9, %v45_v17 }
  0x1d   :  { %v40_v20 = vsel %vm39_vm4, %v75_v8, %v36_v18 }
  0x1e   :  { %v51_v21 = vmul.f32 %v40_v20, %v23_v0  ;;  %v50_v22 = vsel %vm49_vm5, %v77_v9, %v46_v19 }
  0x1f   :  { %v52_v23 = vmul.f32 %v50_v22, %v24_v1 }
  0x20   :  { %53 = vst [vmem:[#allocation5] sm:$0xff] %v51_v21 }
  0x21   :  { %54 = vst [vmem:[#allocation5 + $0x8] sm:$0xff] %v52_v23 }
  0x22   :  { %65 = dma.vmem_to_hbm [thread:$0]  %s61_s11, 256, %s63_s14, [#allocation4]  }
  0x23   :  { %128 = dma.done.wait [#allocation4], 256  }
  0x24   :  { %129 = vsyncadd [#allocation4], 4294967040 }
  0x25   :  { %70 = vsyncpa [#allocation3], 1 }
  0x26   :  { %71 = vsyncpa [#allocation4], 1 }

</bundles_post_ra>
